<compile_context>
chip_gen: v7x
topology: tpu7x:2x2x1
jax: 0.10.0
libtpu: 0.0.40
codegen_flags: <defaults>
</compile_context>

<pallas_src>
import functools

import jax
import jax.numpy as jnp
from jax.experimental import pallas as pl
from jax.experimental.pallas import tpu as pltpu


def _round_up(x, m):
    return ((x + m - 1) // m) * m


def _flash_fwd_kernel(q_ref, k_ref, v_ref, o_ref, m_ref, l_ref, acc_ref, *,
                      s_valid, tk, mask_kv, scale, mxu_dtype):
    """One (batch, q-tile, kv-tile) grid step of flash attention forward."""
    ki = pl.program_id(2)

    @pl.when(ki == 0)
    def _init():
        m_ref[...] = jnp.full_like(m_ref, -jnp.inf)
        l_ref[...] = jnp.zeros_like(l_ref)
        acc_ref[...] = jnp.zeros_like(acc_ref)

    q = q_ref[...].astype(mxu_dtype)          # [tq, Dp]
    kt = k_ref[...].astype(mxu_dtype)         # [tk, Dp]

    # scores = q @ k^T : contract over D of BOTH operands -> no materialized
    # [Dp, tk] transpose, MXU consumes the transposed operand natively.
    s = jax.lax.dot_general(
        q, kt,
        dimension_numbers=(((1,), (1,)), ((), ())),
        preferred_element_type=jnp.float32)   # [tq, tk] f32

    if scale is not None:
        s = s * scale

    if mask_kv:
        # Mask padded kv columns (only the last kv tile can contain padding).
        kv_idx = ki * tk + jax.lax.broadcasted_iota(jnp.int32, s.shape, 1)
        s = jnp.where(kv_idx < s_valid, s, -1e30)

    # --- online softmax update (all statistics in f32) ---
    m_prev = m_ref[...]                                        # [tq, 1]
    m_new = jnp.maximum(m_prev, jnp.max(s, axis=-1, keepdims=True))
    alpha = jnp.exp(m_prev - m_new)                            # rescale factor
    p = jnp.exp(s - m_new)                                     # [tq, tk]

    l_ref[...] = alpha * l_ref[...] + jnp.sum(p, axis=-1, keepdims=True)
    acc_ref[...] = alpha * acc_ref[...] + jnp.dot(
        p.astype(mxu_dtype), v_ref[...].astype(mxu_dtype),
        preferred_element_type=jnp.float32)                    # [tq, Dp]
    m_ref[...] = m_new

    @pl.when(ki == pl.num_programs(2) - 1)
    def _finalize():
        inv_l = pl.reciprocal(l_ref[...], approx=True)
        o_ref[...] = (acc_ref[...] * inv_l).astype(o_ref.dtype)


def scaled_dot_product_attention(q, k, v, scale=None, *,
                                 block_q=256, block_k=256,
                                 mxu_dtype=jnp.bfloat16):
    """q, k, v: [B, S, D]. Returns context [B, S, D] (softmax(q k^T [*scale]) v)."""
    B, S, D = q.shape
    assert k.shape == (B, S, D) and v.shape == (B, S, D)
    out_dtype = q.dtype

    # ---- pad to TPU-friendly tile sizes ((8, 128) granularity) ----
    Dp = _round_up(D, 128)
    tq = min(block_q, _round_up(S, 8))      # sublane dim of q / out tiles
    tk = min(block_k, _round_up(S, 128))    # lane dim of the scores tile: keep lane-dense
    Sq = _round_up(S, tq)
    Sk = _round_up(S, tk)

    qp = jnp.pad(q, ((0, 0), (0, Sq - S), (0, Dp - D)))
    kp = jnp.pad(k, ((0, 0), (0, Sk - S), (0, Dp - D)))
    vp = jnp.pad(v, ((0, 0), (0, Sk - S), (0, Dp - D)))

    n_q = Sq // tq
    n_k = Sk // tk

    kernel = functools.partial(
        _flash_fwd_kernel,
        s_valid=S,
        tk=tk,
        mask_kv=(Sk != S),
        scale=(float(scale) if scale else None),
        mxu_dtype=mxu_dtype,
    )

    out = pl.pallas_call(
        kernel,
        out_shape=jax.ShapeDtypeStruct((B, Sq, Dp), out_dtype),
        grid_spec=pltpu.PrefetchScalarGridSpec(
            num_scalar_prefetch=0,
            grid=(B, n_q, n_k),
            in_specs=[
                # batch dim squeezed out of the kernel view
                pl.BlockSpec((None, tq, Dp), lambda b, qi, ki: (b, qi, 0)),  # q
                pl.BlockSpec((None, tk, Dp), lambda b, qi, ki: (b, ki, 0)),  # k
                pl.BlockSpec((None, tk, Dp), lambda b, qi, ki: (b, ki, 0)),  # v
            ],
            out_specs=pl.BlockSpec((None, tq, Dp), lambda b, qi, ki: (b, qi, 0)),
            scratch_shapes=[
                pltpu.VMEM((tq, 1), jnp.float32),    # running max
                pltpu.VMEM((tq, 1), jnp.float32),    # running denominator
                pltpu.VMEM((tq, Dp), jnp.float32),   # f32 output accumulator
            ],
        ),
        compiler_params=pltpu.CompilerParams(
            dimension_semantics=("parallel", "parallel", "arbitrary"),
        ),
    )(qp, kp, vp)

    return out[:, :S, :D]


def _reference(q, k, v, scale=None, mxu_dtype=jnp.bfloat16):
    """Plain-JAX reference with the same mixed precision as the kernel
    (bf16 matmul operands, f32 accumulation / softmax)."""
    s = jnp.einsum("bsd,btd->bst",
                   q.astype(mxu_dtype), k.astype(mxu_dtype),
                   preferred_element_type=jnp.float32)
    if scale:
        s = s * scale
    p = jax.nn.softmax(s, axis=-1)
    out = jnp.einsum("bst,btd->bsd",
                     p.astype(mxu_dtype), v.astype(mxu_dtype),
                     preferred_element_type=jnp.float32)
    return out.astype(q.dtype)


if __name__ == "__main__":
    key = jax.random.PRNGKey(0)

    # Case 1: shapes from the module's example (B=2, S=10, D=512).
    B, S, D = 2, 10, 512
    kq, kk, kv = jax.random.split(key, 3)
    q = jax.random.normal(kq, (B, S, D), dtype=jnp.float32)
    k = jax.random.normal(kk, (B, S, D), dtype=jnp.float32)
    v = jax.random.normal(kv, (B, S, D), dtype=jnp.float32)

    out = jax.block_until_ready(scaled_dot_product_attention(q, k, v))
    ref = _reference(q, k, v)
    assert out.shape == (B, S, D)
    assert jnp.allclose(out, ref, atol=2e-2, rtol=2e-2), "mismatch vs reference (case 1)"

    # Case 2: multi-tile path (several q and kv tiles + ragged kv tail).
    B2, S2, D2 = 2, 640, 256
    kq2, kk2, kv2 = jax.random.split(jax.random.PRNGKey(1), 3)
    q2 = jax.random.normal(kq2, (B2, S2, D2), dtype=jnp.float32)
    k2 = jax.random.normal(kk2, (B2, S2, D2), dtype=jnp.float32)
    v2 = jax.random.normal(kv2, (B2, S2, D2), dtype=jnp.float32)

    out2 = jax.block_until_ready(scaled_dot_product_attention(q2, k2, v2))
    ref2 = _reference(q2, k2, v2)
    assert out2.shape == (B2, S2, D2)
    assert jnp.allclose(out2, ref2, atol=2e-2, rtol=2e-2), "mismatch vs reference (case 2)"

    print("KERNEL_OK")
</pallas_src>

<mosaic_0001>
module attributes {stable_mosaic.version = 11 : i64} {
  func.func @_flash_fwd_kernel(%arg0: i32, %arg1: i32, %arg2: i32, %arg3: memref<1x16x512xf32, #tpu.memory_space<vmem>>, %arg4: memref<1x128x512xf32, #tpu.memory_space<vmem>>, %arg5: memref<1x128x512xf32, #tpu.memory_space<vmem>>, %arg6: memref<1x16x512xf32, #tpu.memory_space<vmem>>, %arg7: memref<16x1xf32, #tpu.memory_space<vmem>>, %arg8: memref<16x1xf32, #tpu.memory_space<vmem>>, %arg9: memref<16x512xf32, #tpu.memory_space<vmem>>) attributes {dimension_semantics = [#tpu.dimension_semantics<parallel>, #tpu.dimension_semantics<parallel>, #tpu.dimension_semantics<arbitrary>], iteration_bounds = array<i64: 2, 1, 1>, scalar_prefetch = 0 : i64, scratch_operands = 3 : i64, tpu.core_type = #tpu.core_type<tc>, window_params = [{transform_indices = @transform_0, window_bounds = array<i64: 1, 16, 512>}, {transform_indices = @transform_1, window_bounds = array<i64: 1, 128, 512>}, {transform_indices = @transform_2, window_bounds = array<i64: 1, 128, 512>}, {transform_indices = @transform_3, window_bounds = array<i64: 1, 16, 512>}]} {
    %c0_i32 = arith.constant 0 : i32
    %0 = arith.cmpi eq, %arg2, %c0_i32 : i32
    %1 = arith.extui %0 : i1 to i32
    %c0_i32_0 = arith.constant 0 : i32
    %2 = arith.cmpi ne, %1, %c0_i32_0 : i32
    scf.if %2 {
      %cst_27 = arith.constant 0xFF800000 : f32
      %47 = vector.broadcast %cst_27 : f32 to vector<16x1xf32>
      %c0_28 = arith.constant 0 : index
      %c0_29 = arith.constant 0 : index
      %48 = vector.load %arg7[%c0_28, %c0_29] : memref<16x1xf32, #tpu.memory_space<vmem>>, vector<16x1xf32>
      tpu.vector_store %arg7[%c0_28, %c0_29], %47 {strides = array<i32>} : memref<16x1xf32, #tpu.memory_space<vmem>>, vector<16x1xf32>,
      %cst_30 = arith.constant 0.000000e+00 : f32
      %49 = vector.broadcast %cst_30 : f32 to vector<16x1xf32>
      %c0_31 = arith.constant 0 : index
      %c0_32 = arith.constant 0 : index
      %50 = vector.load %arg8[%c0_31, %c0_32] : memref<16x1xf32, #tpu.memory_space<vmem>>, vector<16x1xf32>
      tpu.vector_store %arg8[%c0_31, %c0_32], %49 {strides = array<i32>} : memref<16x1xf32, #tpu.memory_space<vmem>>, vector<16x1xf32>,
      %cst_33 = arith.constant 0.000000e+00 : f32
      %51 = vector.broadcast %cst_33 : f32 to vector<16x512xf32>
      %c0_34 = arith.constant 0 : index
      %c0_35 = arith.constant 0 : index
      %52 = vector.load %arg9[%c0_34, %c0_35] : memref<16x512xf32, #tpu.memory_space<vmem>>, vector<16x512xf32>
      tpu.vector_store %arg9[%c0_34, %c0_35], %51 {strides = array<i32>} : memref<16x512xf32, #tpu.memory_space<vmem>>, vector<16x512xf32>,
    } else {
    }
    %c0 = arith.constant 0 : index
    %c0_1 = arith.constant 0 : index
    %c0_2 = arith.constant 0 : index
    %3 = vector.load %arg3[%c0, %c0_1, %c0_2] : memref<1x16x512xf32, #tpu.memory_space<vmem>>, vector<1x16x512xf32>
    %4 = vector.shape_cast %3 : vector<1x16x512xf32> to vector<16x512xf32>
    %5 = arith.truncf %4 : vector<16x512xf32> to vector<16x512xbf16>
    %c0_3 = arith.constant 0 : index
    %c0_4 = arith.constant 0 : index
    %c0_5 = arith.constant 0 : index
    %6 = vector.load %arg4[%c0_3, %c0_4, %c0_5] : memref<1x128x512xf32, #tpu.memory_space<vmem>>, vector<1x128x512xf32>
    %7 = vector.shape_cast %6 : vector<1x128x512xf32> to vector<128x512xf32>
    %8 = arith.truncf %7 : vector<128x512xf32> to vector<128x512xbf16>
    %cst = arith.constant dense<0.000000e+00> : vector<16x128xf32>
    %9 = tpu.matmul %5, %8, %cst {dimension_numbers = #tpu.dot_dimension_numbers<[1], [1], [0], [0], [0, 0, 1, 0], [], []>} : vector<16x512xbf16>, vector<128x512xbf16>, vector<16x128xf32> -> vector<16x128xf32>
    %c128_i32 = arith.constant 128 : i32
    %10 = arith.muli %arg2, %c128_i32 : i32
    %11 = tpu.iota {dimensions = array<i32: 1>} : vector<16x128xi32>
    %12 = vector.broadcast %10 : i32 to vector<16x128xi32>
    %13 = arith.addi %12, %11 : vector<16x128xi32>
    %c10_i32 = arith.constant 10 : i32
    %14 = vector.broadcast %c10_i32 : i32 to vector<16x128xi32>
    %15 = arith.cmpi slt, %13, %14 : vector<16x128xi32>
    %cst_6 = arith.constant -1.000000e+30 : f32
    %16 = vector.broadcast %cst_6 : f32 to vector<16x128xf32>
    %17 = arith.select %15, %9, %16 : vector<16x128xi1>, vector<16x128xf32>
    %c0_7 = arith.constant 0 : index
    %c0_8 = arith.constant 0 : index
    %18 = vector.load %arg7[%c0_7, %c0_8] : memref<16x1xf32, #tpu.memory_space<vmem>>, vector<16x1xf32>
    %cst_9 = arith.constant dense<0xFF800000> : vector<16xf32>
    %19 = vector.multi_reduction <maximumf>, %17, %cst_9 [1] : vector<16x128xf32> to vector<16xf32>
    %20 = vector.shape_cast %19 : vector<16xf32> to vector<16x1xf32>
    %21 = arith.maximumf %18, %20 : vector<16x1xf32>
    %22 = arith.subf %18, %21 : vector<16x1xf32>
    %23 = math.exp %22 : vector<16x1xf32>
    %24 = vector.broadcast %21 : vector<16x1xf32> to vector<16x128xf32>
    %25 = arith.subf %17, %24 : vector<16x128xf32>
    %26 = math.exp %25 : vector<16x128xf32>
    %c0_10 = arith.constant 0 : index
    %c0_11 = arith.constant 0 : index
    %27 = vector.load %arg8[%c0_10, %c0_11] : memref<16x1xf32, #tpu.memory_space<vmem>>, vector<16x1xf32>
    %28 = arith.mulf %23, %27 : vector<16x1xf32>
    %cst_12 = arith.constant dense<0.000000e+00> : vector<16xf32>
    %29 = vector.multi_reduction <add>, %26, %cst_12 [1] : vector<16x128xf32> to vector<16xf32>
    %30 = vector.shape_cast %29 : vector<16xf32> to vector<16x1xf32>
    %31 = arith.addf %28, %30 : vector<16x1xf32>
    %c0_13 = arith.constant 0 : index
    %c0_14 = arith.constant 0 : index
    %32 = vector.load %arg8[%c0_13, %c0_14] : memref<16x1xf32, #tpu.memory_space<vmem>>, vector<16x1xf32>
    tpu.vector_store %arg8[%c0_13, %c0_14], %31 {strides = array<i32>} : memref<16x1xf32, #tpu.memory_space<vmem>>, vector<16x1xf32>,
    %c0_15 = arith.constant 0 : index
    %c0_16 = arith.constant 0 : index
    %33 = vector.load %arg9[%c0_15, %c0_16] : memref<16x512xf32, #tpu.memory_space<vmem>>, vector<16x512xf32>
    %34 = vector.broadcast %23 : vector<16x1xf32> to vector<16x512xf32>
    %35 = arith.mulf %34, %33 : vector<16x512xf32>
    %36 = arith.truncf %26 : vector<16x128xf32> to vector<16x128xbf16>
    %c0_17 = arith.constant 0 : index
    %c0_18 = arith.constant 0 : index
    %c0_19 = arith.constant 0 : index
    %37 = vector.load %arg5[%c0_17, %c0_18, %c0_19] : memref<1x128x512xf32, #tpu.memory_space<vmem>>, vector<1x128x512xf32>
    %38 = vector.shape_cast %37 : vector<1x128x512xf32> to vector<128x512xf32>
    %39 = arith.truncf %38 : vector<128x512xf32> to vector<128x512xbf16>
    %cst_20 = arith.constant dense<0.000000e+00> : vector<16x512xf32>
    %40 = tpu.matmul %36, %39, %cst_20 {dimension_numbers = #tpu.dot_dimension_numbers<[1], [0], [0], [1], [0, 0, 1, 1], [], []>} : vector<16x128xbf16>, vector<128x512xbf16>, vector<16x512xf32> -> vector<16x512xf32>
    %41 = arith.addf %35, %40 : vector<16x512xf32>
    %c0_21 = arith.constant 0 : index
    %c0_22 = arith.constant 0 : index
    %42 = vector.load %arg9[%c0_21, %c0_22] : memref<16x512xf32, #tpu.memory_space<vmem>>, vector<16x512xf32>
    tpu.vector_store %arg9[%c0_21, %c0_22], %41 {strides = array<i32>} : memref<16x512xf32, #tpu.memory_space<vmem>>, vector<16x512xf32>,
    %c0_23 = arith.constant 0 : index
    %c0_24 = arith.constant 0 : index
    %43 = vector.load %arg7[%c0_23, %c0_24] : memref<16x1xf32, #tpu.memory_space<vmem>>, vector<16x1xf32>
    tpu.vector_store %arg7[%c0_23, %c0_24], %21 {strides = array<i32>} : memref<16x1xf32, #tpu.memory_space<vmem>>, vector<16x1xf32>,
    %c0_i32_25 = arith.constant 0 : i32
    %44 = arith.cmpi eq, %arg2, %c0_i32_25 : i32
    %45 = arith.extui %44 : i1 to i32
    %c0_i32_26 = arith.constant 0 : i32
    %46 = arith.cmpi ne, %45, %c0_i32_26 : i32
    scf.if %46 {
      %c0_27 = arith.constant 0 : index
      %c0_28 = arith.constant 0 : index
      %47 = vector.load %arg8[%c0_27, %c0_28] : memref<16x1xf32, #tpu.memory_space<vmem>>, vector<16x1xf32>
      %48 = tpu.reciprocal %47 {approx = true} : vector<16x1xf32> -> vector<16x1xf32>
      %c0_29 = arith.constant 0 : index
      %c0_30 = arith.constant 0 : index
      %49 = vector.load %arg9[%c0_29, %c0_30] : memref<16x512xf32, #tpu.memory_space<vmem>>, vector<16x512xf32>
      %50 = vector.broadcast %48 : vector<16x1xf32> to vector<16x512xf32>
      %51 = arith.mulf %49, %50 : vector<16x512xf32>
      %c0_31 = arith.constant 0 : index
      %c0_32 = arith.constant 0 : index
      %c0_33 = arith.constant 0 : index
      %52 = vector.load %arg6[%c0_31, %c0_32, %c0_33] : memref<1x16x512xf32, #tpu.memory_space<vmem>>, vector<1x16x512xf32>
      %53 = vector.shape_cast %52 : vector<1x16x512xf32> to vector<16x512xf32>
      %54 = vector.shape_cast %51 : vector<16x512xf32> to vector<1x16x512xf32>
      tpu.vector_store %arg6[%c0_31, %c0_32, %c0_33], %54 {strides = array<i32>} : memref<1x16x512xf32, #tpu.memory_space<vmem>>, vector<1x16x512xf32>,
    } else {
    }
    return
  }
  func.func @transform_0(%arg0: i32, %arg1: i32, %arg2: i32) -> (i32, i32, i32) {
    %c0_i32 = arith.constant 0 : i32
    %c0_i32_0 = arith.constant 0 : i32
    return %arg0, %arg1, %c0_i32 : i32, i32, i32
  }
  func.func @transform_1(%arg0: i32, %arg1: i32, %arg2: i32) -> (i32, i32, i32) {
    %c0_i32 = arith.constant 0 : i32
    %c0_i32_0 = arith.constant 0 : i32
    return %arg0, %arg2, %c0_i32 : i32, i32, i32
  }
  func.func @transform_2(%arg0: i32, %arg1: i32, %arg2: i32) -> (i32, i32, i32) {
    %c0_i32 = arith.constant 0 : i32
    %c0_i32_0 = arith.constant 0 : i32
    return %arg0, %arg2, %c0_i32 : i32, i32, i32
  }
  func.func @transform_3(%arg0: i32, %arg1: i32, %arg2: i32) -> (i32, i32, i32) {
    %c0_i32 = arith.constant 0 : i32
    %c0_i32_0 = arith.constant 0 : i32
    return %arg0, %arg1, %c0_i32 : i32, i32, i32
  }
}

</mosaic_0001>

<bundles_post_ra>
// kernel: tpu_custom_call.1
= control target key start
LH: loop header
LB: loop body
LE: loop exit
PB: predicated region body
PF: predicated region fallthrough
CT: control target
= control target key end

     0   :  { %s1786_s0 = inlined_call_operand.hbm [shape: f32[2,16,512], index: 0, kind: input, shape index: {}]   ;;  %s1787_s1 = inlined_call_operand.hbm [shape: f32[2,128,512], index: 1, kind: input, shape index: {}]   ;;  %s1788_s2 = inlined_call_operand.hbm [shape: f32[2,128,512], index: 2, kind: input, shape index: {}]   ;;  %s1789_s3 = inlined_call_operand.hbm [shape: f32[2,16,512], index: 3, kind: output, shape index: {}]  }
   0x1   :  { %1796 = sst [smem:[#allocation18_spill]] %s1787_s1 }
   0x2   :  { %8 = vsyncpa [#allocation6], 0 }
   0x3   :  { %10 = vsyncpa [#allocation6 + $0x1], 0 }
   0x4   :  { %11 = vsyncpa [#allocation9], 0 }
   0x5   :  { %13 = vsyncpa [#allocation9 + $0x1], 0 }
   0x6   :  { %14 = vsyncpa [#allocation7], 0 }
   0x7   :  { %16 = vsyncpa [#allocation7 + $0x1], 0  ;;  %s1322_s12 = smov 0   ;;  %s1324_s13 = smov 0  }
   0x8   :  { %s1326_s14 = smov 0   ;;  %s1328_s15 = smov 0  }
   0x9   :  { %s1330_s16 = smov 0   ;;  %s1332_s17 = smov 0  }
   0xa LB: > { %1797 = sst [smem:[#allocation15_spill]] %s1277_s14  ;;  %s1353_s18 = sadd.s32 4294967295, %s1289_s17   ;;  %s1289_s17 = sphi %s1332_s17, %s22_s17   ;;  %s1285_s16 = sphi %s1330_s16, %s1820_s16   ;;  %s1281_s15 = sphi %s1328_s15, %s1819_s15   ;;  %s1277_s14 = sphi %s1326_s14, %s1815_s14   ;;  %s1273_s13 = sphi %s1324_s13, %s1818_s13   ;;  %s1269_s12 = sphi %s1322_s12, %s1817_s12  }
   0xb   : > { %s990_s19 = sadd.s32 4294967294, %s1289_s17   ;;  %s41_s20 = sadd.s32 1, %s1285_s16 }
   0xc   : > { %s50_s21 = sadd.s32 1, %s1277_s14  ;;  %p43_p0 = scmp.ge.s32.totalorder %s41_s20, 2 }
   0xd   : > { %p57_p1 = scmp.ne.s32.totalorder %s1277_s14, %s1273_s13  ;;  %p58_p2 = scmp.eq.s32.totalorder %s1289_s17, 0 }
   0xe   : > { %p63_p3 = scmp.ne.s32.totalorder %s1273_s13, %s1269_s12  ;;  %s1822_s20 = smov (%p43_p0, %s41_s20), 0 }
   0xf   : > { %1798 = sst [smem:[#allocation16_spill]] %s1822_s20  ;;  %p1365_p4 = por %p58_p2, %p57_p1 }
  0x10   : > { %p64_p5 = scmp.eq.s32.totalorder %s1353_s18, 0  ;;  %s45_s23 = ssub.s32 %s1285_s16, %s1822_s20 }
  0x11   : > { %p145_p6 = scmp.eq.s32.totalorder %s1353_s18, 1  ;;  %p48_p7 = scmp.eq.s32.totalorder %s45_s23, 0 }
  0x12   : > { %p1373_p8 = por %p64_p5, %p63_p3  ;;  %p151_p10 = scmp.eq.s32.totalorder %s990_s19, 1 }
  0x13   : > { %p1377_p9 = por %p145_p6, %p57_p1  ;;  %p1042_p13 = scmp.lt.s32.totalorder %s1289_s17, 2 }
  0x14   : > { %s1800_s24 = scalar_select %p1373_p8, 1, 0 }
  0x15   : > { %s1801_s25 = scalar_select %p1377_p9, 1, 0 }
  0x16   : > { %s1382_s26 = scalar_select %p48_p7, %s1277_s14, %s50_s21  }
  0x17   : > { %p1384_p11 = por %p151_p10, %p63_p3  ;;  %s1391_s28 = sand.u32 1, %s1277_s14  }
  0x18   : > { %1802 = sst [smem:[#allocation17_spill]] %s1382_s26  ;;  %p1395_p0 = pnand %p1042_p13, %p1365_p4 }
  0x19   : > { %s1803_s27 = scalar_select %p1384_p11, 1, 0 }
  0x1a   : > { %s195_s30 = sand.u32 1, %s1289_s17   ;;  %s996_s4 = sshll.u32 %s1391_s28, 9 }
  0x1b   : > { %s1013_s5 = sshll.u32 %s1285_s16, 13  ;;  %s199_s6 = scalar_lea.vmem [#allocation8], %s996_s4 }
  0x1c   : > { %s209_s7 = sshll.u32 %s199_s6, 4  ;;  %s1805_s1 = sld [smem:[#allocation18_spill]]  ;;  %s1411_s7 = int_to_ptr.vmem [resolvable:$true] %s209_s7 }
  0x1d   : > { %s1413_s11 = scalar_lea.sflag [#allocation9], %s195_s30  ;;  %p1419_p2 = pneg %p1395_p0 }
  0x22   : > { %s1409_s10 = scalar_lea.hbm %s1805_s1, %s1013_s5  ;;  %s1118_s6 = scalar_lea.hbm %s1805_s1, 16384 }
  0x23   : > { %s1113_s19 = scalar_lea.hbm %s1409_s10, 8192  ;;  %p1119_p5 = scmp.lt.u32.totalorder %s1409_s10, %s1805_s1 }
  0x24   : > { %p1114_p1 = scmp.ne.s32.totalorder %s1409_s10, %s1113_s19  ;;  %p1120_p6 = scmp.lt.u32.totalorder %s1118_s6, %s1113_s19 }
  0x25   : > { %p1122_p10 = scmp.lt.u32.totalorder %s1113_s19, %s1409_s10 }
  0x26   : > { %p1116_p3 = pnand %p1419_p2, %p1114_p1  ;;  %p1121_p7 = por %p1120_p6, %p1119_p5 }
  0x28   : > { %p1117_p4 = pneg %p1116_p3  ;;  %p1123_p13 = por %p1122_p10, %p1121_p7 }
  0x2a   : > { %p1124_p12 = pnand %p1123_p13, %p1117_p4 }
  0x2c   : > { %1127 = shalt.err (!%p1124_p12)
}
  0x2d   : > { %s1128_s30 = scalar_lea.vmem %s1411_s7, 8192  ;;  %s1291_s22 = smov [#allocation8]  }
  0x2e   : > { %p1129_p1 = scmp.ne.s32.totalorder %s1411_s7, %s1128_s30  ;;  %s1133_s23 = sshll.u32 %s1291_s22, 4  ;;  %s1134_s23 = int_to_ptr.vmem [resolvable:$false] %s1133_s23 }
  0x2f   : > { %s1135_s8 = scalar_lea.vmem %s1134_s23, 16384  ;;  %p1136_p9 = scmp.lt.s32.totalorder %s1411_s7, %s1134_s23 }
  0x30   : > { %p1131_p3 = pnand %p1129_p1, %p1419_p2  ;;  %p1137_p8 = scmp.lt.s32.totalorder %s1135_s8, %s1128_s30 }
  0x32   : > { %p1132_p11 = pneg %p1131_p3  ;;  %p1138_p5 = por %p1137_p8, %p1136_p9 }
  0x34   : > { %p1139_p6 = pnand %p1138_p5, %p1132_p11 }
  0x36   : > { %1142 = shalt.err (!%p1139_p6)
}
  0x37   : > { %s1794_s19 = smov 512   ;;  %s1293_s6 = smov 32  }
  0x38   : > { %1034 = dma.hbm_to_vmem [thread:$0]  (!%p1395_p0), %s1409_s10, 8192, %s1411_s7, %s1413_s11, %s1794_s19, %s1794_s19, %s1293_s6  }
  0x39   : > { %s1451_s22 = scalar_lea.hbm %s1788_s2, %s1013_s5  ;;  %p1002_p8 = scmp.ge.s32.totalorder %s1289_s17, 1 }
  0x3a   : > { %s223_s23 = scalar_lea.vmem [#allocation10], %s996_s4  ;;  %p241_p9 = scmp.lt.s32.totalorder %s1289_s17, 3 }
  0x3b   : > { %s233_s8 = sshll.u32 %s223_s23, 4  ;;  %s993_s20 = sshll.u32 %s1391_s28, 6  ;;  %s1468_s8 = int_to_ptr.vmem [resolvable:$true] %s233_s8 }
  0x3c   : > { %p1457_p11 = pnand %p1002_p8, %p241_p9  ;;  %s1012_s26 = sshll.u32 %s1285_s16, 10 }
  0x3d   : > { %s1466_s10 = scalar_lea.hbm %s1786_s0, %s1012_s26  ;;  %s175_s4 = scalar_lea.vmem [#allocation5], %s993_s20 }
  0x3e   : > { %s1807_s1 = scalar_select %p1457_p11, 1, 0 }
  0x3f   : > { %s185_s5 = sshll.u32 %s175_s4, 4  ;;  %s172_s9 = scalar_lea.sflag [#allocation6], %s1391_s28  ;;  %s1470_s5 = int_to_ptr.vmem [resolvable:$true] %s185_s5 }
  0x40   : > { %s1143_s30 = scalar_lea.hbm %s1466_s10, 1024  ;;  %s1148_s26 = scalar_lea.hbm %s1786_s0, 2048 }
  0x41   : > { %p1144_p12 = scmp.ne.s32.totalorder %s1466_s10, %s1143_s30  ;;  %p1149_p10 = scmp.lt.u32.totalorder %s1466_s10, %s1786_s0 }
  0x42   : > { %p1150_p13 = scmp.lt.u32.totalorder %s1148_s26, %s1143_s30  ;;  %p1152_p3 = scmp.lt.u32.totalorder %s1143_s30, %s1466_s10 }
  0x43   : > { %p1146_p4 = pnand %p1144_p12, %p1419_p2 }
  0x44   : > { %p1151_p1 = por %p1150_p13, %p1149_p10 }
  0x45   : > { %p1147_p7 = pneg %p1146_p4 }
  0x46   : > { %p1153_p5 = por %p1152_p3, %p1151_p1 }
  0x48   : > { %p1154_p6 = pnand %p1153_p5, %p1147_p7 }
  0x4a   : > { %1157 = shalt.err (!%p1154_p6)
}
  0x4b   : > { %s1158_s20 = scalar_lea.vmem %s1470_s5, 1024  ;;  %s1294_s4 = smov [#allocation5]  }
  0x4c   : > { %p1159_p8 = scmp.ne.s32.totalorder %s1470_s5, %s1158_s20  ;;  %s1163_s23 = sshll.u32 %s1294_s4, 4  ;;  %s1164_s23 = int_to_ptr.vmem [resolvable:$false] %s1163_s23 }
  0x4d   : > { %s1165_s19 = scalar_lea.vmem %s1164_s23, 2048  ;;  %p1166_p4 = scmp.lt.s32.totalorder %s1470_s5, %s1164_s23 }
  0x4e   : > { %p1161_p9 = pnand %p1159_p8, %p1419_p2  ;;  %p1167_p11 = scmp.lt.s32.totalorder %s1165_s19, %s1158_s20 }
  0x50   : > { %p1162_p12 = pneg %p1161_p9  ;;  %p1168_p10 = por %p1167_p11, %p1166_p4 }
  0x52   : > { %p1169_p13 = pnand %p1168_p10, %p1162_p12 }
  0x54   : > { %1172 = shalt.err (!%p1169_p13)
}
  0x55   : > { %s1808_s30 = smov 512   ;;  %s1173_s14 = scalar_lea.hbm %s1451_s22, 8192 }
  0x56   : > { %1031 = dma.hbm_to_vmem [thread:$0]  (!%p1395_p0), %s1466_s10, 1024, %s1470_s5, %s172_s9, %s1808_s30, %s1808_s30, %s1293_s6  }
  0x57   : > { %p1174_p7 = scmp.ne.s32.totalorder %s1451_s22, %s1173_s14  ;;  %s1178_s20 = scalar_lea.hbm %s1788_s2, 16384 }
  0x58   : > { %p1179_p3 = scmp.lt.u32.totalorder %s1451_s22, %s1788_s2  ;;  %p1180_p5 = scmp.lt.u32.totalorder %s1178_s20, %s1173_s14 }
  0x59   : > { %p1176_p11 = pnand %p1174_p7, %p1419_p2  ;;  %p1182_p8 = scmp.lt.u32.totalorder %s1173_s14, %s1451_s22 }
  0x5a   : > { %p1181_p6 = por %p1180_p5, %p1179_p3 }
  0x5b   : > { %p1177_p1 = pneg %p1176_p11 }
  0x5c   : > { %p1183_p9 = por %p1182_p8, %p1181_p6 }
  0x5e   : > { %p1184_p12 = pnand %p1183_p9, %p1177_p1 }
  0x60   : > { %1187 = shalt.err (!%p1184_p12)
}
  0x61   : > { %s1188_s28 = scalar_lea.vmem %s1468_s8, 8192  ;;  %s1295_s10 = smov [#allocation10]  }
  0x62   : > { %p1189_p4 = scmp.ne.s32.totalorder %s1468_s8, %s1188_s28  ;;  %s1193_s5 = sshll.u32 %s1295_s10, 4  ;;  %s1194_s5 = int_to_ptr.vmem [resolvable:$false] %s1193_s5 }
  0x63   : > { %s1195_s9 = scalar_lea.vmem %s1194_s5, 16384  ;;  %p1196_p7 = scmp.lt.s32.totalorder %s1468_s8, %s1194_s5 }
  0x64   : > { %p1191_p10 = pnand %p1189_p4, %p1419_p2  ;;  %p1197_p11 = scmp.lt.s32.totalorder %s1195_s9, %s1188_s28 }
  0x66   : > { %p1192_p13 = pneg %p1191_p10  ;;  %p1198_p3 = por %p1197_p11, %p1196_p7 }
  0x68   : > { %p1199_p5 = pnand %p1198_p3, %p1192_p13 }
  0x6a   : > { %1202 = shalt.err (!%p1199_p5)
}
  0x6b   : > { %1037 = dma.hbm_to_vmem [thread:$0]  (!%p1395_p0), %s1451_s22, 8192, %s1468_s8, %s1413_s11, %s1808_s30, %s1808_s30, %s1293_s6  }
  0x6c   : > { %p1809_p2 = scmp.ne.s32.totalorder %s1807_s1, 0 }
  0x6d   : > { %s1527_s21 = sand.u32 (!%p1809_p2), 1, %s1273_s13   ;;  %p1810_p1 = scmp.ne.s32.totalorder (!%p1809_p2), %s1800_s24, 0 }
  0x6e   : > { %245 = sbr.rel (%p1809_p2) target bundleno = 1066 (0x42a), region = 32  ;;  %s1003_s19 = sshll.u32 (!%p1809_p2), %s1527_s21, 6 }
  0x6f   : > { %s248_s14 = scalar_lea.sflag (!%p1809_p2), [#allocation6], %s1527_s21  ;;  %s1533_s29 = scalar_lea.vmem (!%p1809_p2), [#allocation5], %s1003_s19 }
  0x75   : > { %1256 = dma.done.wait (%p1810_p1), %s248_s14, 1024  }
  0x76   : > { %1258 = vsyncadd (%p1810_p1), %s248_s14, 4294966272  ;;  %s256_s1 = sand.u32 1, %s1353_s18   ;;  %s1004_s11 = sshll.u32 %s1527_s21, 9 }
  0x77   : > { %s257_s6 = scalar_lea.sflag [#allocation9], %s256_s1  ;;  %s1543_s22 = scalar_lea.vmem [#allocation8], %s1004_s11 }
  0x78   : > { %1260 = dma.done.wait (%p1810_p1), %s257_s6, 16384  }
  0x79   : > { %1262 = vsyncadd (%p1810_p1), %s257_s6, 4294950912  ;;  %v337_v0 = vld [vmem:[%s1543_s22 + $0x8] sm:$0xff]  ;;  %v336_v2 = vld [vmem:[%s1543_s22] sm:$0xff]  ;;  %vm311_vm0 = vcmask 7168   ;;  %s1636_s18 = scalar_lea.vmem [#allocation10], %s1004_s11  ;;  %s1015_s24 = sshll.u32 %s1281_s15, 10 }
  0x7a   : > { %v341_v1 = vld [vmem:[%s1543_s22 + $0x28] sm:$0xff]  ;;  %v340_v4 = vld [vmem:[%s1543_s22 + $0x20] sm:$0xff]  ;;  %v339_v50 = vld [vmem:[%s1543_s22 + $0x18] sm:$0xff]  ;;  %s301_s8 = scalar_lea.vmem [#allocation11], %s1003_s19  ;;  %s1735_s20 = scalar_lea.hbm %s1789_s3, %s1015_s24 }
  0x7b   : > { %v401_v3 = vpack.c.bf16 %v341_v1, %v337_v0  ;;  %v345_v5 = vld [vmem:[%s1543_s22 + $0x48] sm:$0xff]  ;;  %v400_v7 = vpack.c.bf16 %v340_v4, %v336_v2  ;;  %v344_v9 = vld [vmem:[%s1543_s22 + $0x40] sm:$0xff]  ;;  %v343_v51 = vld [vmem:[%s1543_s22 + $0x38] sm:$0xff]  ;;  %s850_s30 = sshll.u32 %s301_s8, 4  ;;  %s834_s15 = scalar_lea.sflag [#allocation7], %s1527_s21  ;;  %s1737_s30 = int_to_ptr.vmem [resolvable:$true] %s850_s30 }
  0x7c   : > { %v349_v6 = vld [vmem:[%s1543_s22 + $0x68] sm:$0xff]  ;;  %v348_v10 = vld [vmem:[%s1543_s22 + $0x60] sm:$0xff]  ;;  %v403_v53 = vpack.c.bf16 %v343_v51, %v339_v50  ;;  %v338_v56 = vld [vmem:[%s1543_s22 + $0x10] sm:$0xff]  ;;  %s1203_s4 = scalar_lea.vmem %s1737_s30, 1024  ;;  %p1811_p6 = scmp.ne.s32.totalorder %s1801_s25, 0 }
  0x7d   : > { %v405_v8 = vpack.c.bf16 %v349_v6, %v345_v5  ;;  %432 = vmatprep.subr.bf16.mxu0 %v401_v3  ;;  %v353_v11 = vld [vmem:[%s1543_s22 + $0x88] sm:$0xff]  ;;  %v404_v13 = vpack.c.bf16 %v348_v10, %v344_v9  ;;  %v352_v18 = vld [vmem:[%s1543_s22 + $0x80] sm:$0xff]  ;;  %v342_v57 = vld [vmem:[%s1543_s22 + $0x30] sm:$0xff]  ;;  %p1204_p0 = scmp.ne.s32.totalorder %s1737_s30, %s1203_s4  ;;  %s1299_s23 = smov [#allocation11]  }
  0x7e   : > { %433 = vmatpush1.bf16.xpose.msra.mxu0 %v400_v7  ;;  %v357_v12 = vld [vmem:[%s1543_s22 + $0xa8] sm:$0xff]  ;;  %v356_v19 = vld [vmem:[%s1543_s22 + $0xa0] sm:$0xff]  ;;  %v327_v58 = vld [vmem:[%s1533_s29 + $0x18] sm:$0xff]  ;;  %v402_v63 = vpack.c.bf16 %v342_v57, %v338_v56  ;;  %s1207_s28 = sshll.u32 %s1299_s23, 4  ;;  %s1208_s28 = int_to_ptr.vmem [resolvable:$false] %s1207_s28 }
  0x7f   : > { %434 = vmatprep.subr.bf16.mxu0 %v405_v8  ;;  %v409_v14 = vpack.c.bf16 %v357_v12, %v353_v11  ;;  %v325_v15 = vld [vmem:[%s1533_s29 + $0x8] sm:$0xff]  ;;  %v408_v22 = vpack.c.bf16 %v356_v19, %v352_v18  ;;  %v360_v24 = vld [vmem:[%s1543_s22 + $0xc0] sm:$0xff]  ;;  %v331_v59 = vld [vmem:[%s1533_s29 + $0x38] sm:$0xff]  ;;  %p1205_p8 = pnand %p1204_p0, %p1811_p6  ;;  %s1209_s10 = scalar_lea.vmem %s1208_s28, 2048 }
  0x80   : > { %v329_v16 = vld [vmem:[%s1533_s29 + $0x28] sm:$0xff]  ;;  %v364_v25 = vld [vmem:[%s1543_s22 + $0xe0] sm:$0xff]  ;;  %v347_v60 = vld [vmem:[%s1543_s22 + $0x58] sm:$0xff]  ;;  %v335_v0 = vpack.c.bf16 %v331_v59, %v327_v58  ;;  %p1210_p12 = scmp.lt.s32.totalorder %s1737_s30, %s1208_s28  ;;  %p1211_p4 = scmp.lt.s32.totalorder %s1209_s10, %s1203_s4 }
  0x81   : > { %v333_v17 = vpack.c.bf16 %v329_v16, %v325_v15  ;;  %v361_v20 = vld [vmem:[%s1543_s22 + $0xc8] sm:$0xff]  ;;  %v412_v28 = vpack.c.bf16 %v364_v25, %v360_v24  ;;  %v368_v30 = vld [vmem:[%s1543_s22 + $0x100] sm:$0xff]  ;;  %v351_v61 = vld [vmem:[%s1543_s22 + $0x78] sm:$0xff]  ;;  %p1206_p9 = pneg %p1205_p8 }
  0x82   : > { %v365_v21 = vld [vmem:[%s1543_s22 + $0xe8] sm:$0xff]  ;;  %v372_v31 = vld [vmem:[%s1543_s22 + $0x120] sm:$0xff]  ;;  %v407_v1 = vpack.c.bf16 %v351_v61, %v347_v60  ;;  %v346_v2 = vld [vmem:[%s1543_s22 + $0x50] sm:$0xff]  ;;  %p1212_p10 = por %p1211_p4, %p1210_p12 }
  0x83   : > { %464 = vmatprep.mubr.bf16.mxu0 %v333_v17  ;;  %v413_v23 = vpack.c.bf16 %v365_v21, %v361_v20  ;;  %v369_v26 = vld [vmem:[%s1543_s22 + $0x108] sm:$0xff]  ;;  %v416_v34 = vpack.c.bf16 %v372_v31, %v368_v30  ;;  %v376_v36 = vld [vmem:[%s1543_s22 + $0x140] sm:$0xff]  ;;  %v350_v3 = vld [vmem:[%s1543_s22 + $0x70] sm:$0xff] }
  0x84   : > { %v373_v27 = vld [vmem:[%s1543_s22 + $0x128] sm:$0xff]  ;;  %v380_v37 = vld [vmem:[%s1543_s22 + $0x160] sm:$0xff]  ;;  %v355_v4 = vld [vmem:[%s1543_s22 + $0x98] sm:$0xff]  ;;  %v406_v6 = vpack.c.bf16 %v350_v3, %v346_v2  ;;  %p1213_p13 = pnand %p1212_p10, %p1206_p9 }
  0x85   : > { %v417_v29 = vpack.c.bf16 %v373_v27, %v369_v26  ;;  %v377_v32 = vld [vmem:[%s1543_s22 + $0x148] sm:$0xff]  ;;  %v420_v40 = vpack.c.bf16 %v380_v37, %v376_v36  ;;  %v384_v42 = vld [vmem:[%s1543_s22 + $0x180] sm:$0xff]  ;;  %v359_v5 = vld [vmem:[%s1543_s22 + $0xb8] sm:$0xff] }
  0x86   : > { %435 = vmatpush1.bf16.xpose.msra.mxu0 %v404_v13  ;;  %v381_v33 = vld [vmem:[%s1543_s22 + $0x168] sm:$0xff]  ;;  %v388_v43 = vld [vmem:[%s1543_s22 + $0x1a0] sm:$0xff]  ;;  %v411_v7 = vpack.c.bf16 %v359_v5, %v355_v4  ;;  %v354_v8 = vld [vmem:[%s1543_s22 + $0x90] sm:$0xff] }
  0x87   : > { %436 = vmatprep.subr.bf16.mxu0 %v409_v14  ;;  %v421_v35 = vpack.c.bf16 %v381_v33, %v377_v32  ;;  %v385_v38 = vld [vmem:[%s1543_s22 + $0x188] sm:$0xff]  ;;  %v424_v46 = vpack.c.bf16 %v388_v43, %v384_v42  ;;  %v392_v48 = vld [vmem:[%s1543_s22 + $0x1c0] sm:$0xff]  ;;  %v358_v9 = vld [vmem:[%s1543_s22 + $0xb0] sm:$0xff] }
  0x88   : > { %v389_v39 = vld [vmem:[%s1543_s22 + $0x1a8] sm:$0xff]  ;;  %v396_v49 = vld [vmem:[%s1543_s22 + $0x1e0] sm:$0xff]  ;;  %v363_v10 = vld [vmem:[%s1543_s22 + $0xd8] sm:$0xff]  ;;  %v410_v12 = vpack.c.bf16 %v358_v9, %v354_v8 }
  0x89   : > { %v425_v41 = vpack.c.bf16 %v389_v39, %v385_v38  ;;  %v393_v44 = vld [vmem:[%s1543_s22 + $0x1c8] sm:$0xff]  ;;  %v428_v52 = vpack.c.bf16 %v396_v49, %v392_v48  ;;  %v324_v54 = vld [vmem:[%s1533_s29] sm:$0xff]  ;;  %v367_v11 = vld [vmem:[%s1543_s22 + $0xf8] sm:$0xff] }
  0x8a   : > { %v397_v45 = vld [vmem:[%s1543_s22 + $0x1e8] sm:$0xff]  ;;  %v328_v55 = vld [vmem:[%s1533_s29 + $0x20] sm:$0xff]  ;;  %v415_v13 = vpack.c.bf16 %v367_v11, %v363_v10  ;;  %v362_v14 = vld [vmem:[%s1543_s22 + $0xd0] sm:$0xff] }
  0x8b   : > { %v429_v47 = vpack.c.bf16 %v397_v45, %v393_v44  ;;  %v332_v62 = vpack.c.bf16 %v328_v55, %v324_v54  ;;  %v366_v15 = vld [vmem:[%s1543_s22 + $0xf0] sm:$0xff]  ;;  %v371_v16 = vld [vmem:[%s1543_s22 + $0x118] sm:$0xff]  ;;  %v1296_v44 = vmov -inf   ;;  %v515_v45 = vlaneseq  ;;  %v593_v55 = vld [vmem:[%s1636_s18 + $0x8] sm:$0xff] }
  0x8c   : > { %v375_v17 = vld [vmem:[%s1543_s22 + $0x138] sm:$0xff]  ;;  %v414_v18 = vpack.c.bf16 %v366_v15, %v362_v14  ;;  %v370_v20 = vld [vmem:[%s1543_s22 + $0x110] sm:$0xff]  ;;  %312 = vst.msk [vmem:[#allocation2] sm:$0xff] %vm311_vm0, %v1296_v44  ;;  %313 = vst.msk [vmem:[#allocation2 + $0x8] sm:$0xff] %vm311_vm0, %v1296_v44  ;;  %v1298_v54 = vmov 0.0  }
  0x8d   : > { %v419_v19 = vpack.c.bf16 %v375_v17, %v371_v16  ;;  %v374_v21 = vld [vmem:[%s1543_s22 + $0x130] sm:$0xff]  ;;  %314 = vst.msk [vmem:[#allocation3] sm:$0xff] %vm311_vm0, %v1298_v54  ;;  %315 = vst.msk [vmem:[#allocation3 + $0x8] sm:$0xff] %vm311_vm0, %v1298_v54  ;;  %v597_v56 = vld [vmem:[%s1636_s18 + $0x28] sm:$0xff] }
  0x8e   : > { %437 = vmatpush1.bf16.xpose.msra.mxu0 %v408_v22  ;;  %v379_v22 = vld [vmem:[%s1543_s22 + $0x158] sm:$0xff]  ;;  %v418_v24 = vpack.c.bf16 %v374_v21, %v370_v20  ;;  %v378_v26 = vld [vmem:[%s1543_s22 + $0x150] sm:$0xff]  ;;  %v592_v57 = vld [vmem:[%s1636_s18] sm:$0xff]  ;;  %v657_v58 = vpack.c.bf16 %v597_v56, %v593_v55 }
  0x8f   : > { %438 = vmatprep.subr.bf16.mxu0 %v413_v23  ;;  %v383_v23 = vld [vmem:[%s1543_s22 + $0x178] sm:$0xff]  ;;  %v382_v27 = vld [vmem:[%s1543_s22 + $0x170] sm:$0xff]  ;;  %v596_v59 = vld [vmem:[%s1636_s18 + $0x20] sm:$0xff] }
  0x90   : > { %v423_v25 = vpack.c.bf16 %v383_v23, %v379_v22  ;;  %v422_v30 = vpack.c.bf16 %v382_v27, %v378_v26  ;;  %v386_v32 = vld [vmem:[%s1543_s22 + $0x190] sm:$0xff]  ;;  %v601_v60 = vld [vmem:[%s1636_s18 + $0x48] sm:$0xff]  ;;  %688 = vmatprep.subr.bf16.mxu1 %v657_v58  ;;  %v616_v15 = vld [vmem:[%s1636_s18 + $0xc0] sm:$0xff] }
  0x91   : > { %v390_v33 = vld [vmem:[%s1543_s22 + $0x1b0] sm:$0xff]  ;;  %v605_v61 = vld [vmem:[%s1636_s18 + $0x68] sm:$0xff]  ;;  %v620_v16 = vld [vmem:[%s1636_s18 + $0xe0] sm:$0xff] }
  0x92   : > { %v426_v36 = vpack.c.bf16 %v390_v33, %v386_v32  ;;  %v394_v38 = vld [vmem:[%s1543_s22 + $0x1d0] sm:$0xff]  ;;  %v609_v2 = vld [vmem:[%s1636_s18 + $0x88] sm:$0xff]  ;;  %v628_v26 = vld [vmem:[%s1636_s18 + $0x120] sm:$0xff] }
  0x93   : > { %v398_v39 = vld [vmem:[%s1543_s22 + $0x1f0] sm:$0xff]  ;;  %v613_v3 = vld [vmem:[%s1636_s18 + $0xa8] sm:$0xff]  ;;  %v1650_v9 = vld [vmem:[#allocation2] sm:$0xff] }
  0x94   : > { %v330_v42 = vld [vmem:[%s1533_s29 + $0x30] sm:$0xff]  ;;  %v665_v5 = vpack.c.bf16 %v613_v3, %v609_v2  ;;  %v617_v11 = vld [vmem:[%s1636_s18 + $0xc8] sm:$0xff]  ;;  %v632_v32 = vld [vmem:[%s1636_s18 + $0x140] sm:$0xff] }
  0x95   : > { %v1659_v17 = vld [vmem:[#allocation2 + $0x8] sm:$0xff]  ;;  %v636_v33 = vld [vmem:[%s1636_s18 + $0x160] sm:$0xff]  ;;  %v606_v3 = vld [vmem:[%s1636_s18 + $0x70] sm:$0xff] }
  0x96   : > { %439 = vmatpush1.bf16.xpose.msra.mxu0 %v412_v28  ;;  %v387_v28 = vld [vmem:[%s1543_s22 + $0x198] sm:$0xff]  ;;  %v625_v21 = vld [vmem:[%s1636_s18 + $0x108] sm:$0xff]  ;;  %v648_v44 = vld [vmem:[%s1636_s18 + $0x1c0] sm:$0xff] }
  0x97   : > { %440 = vmatprep.subr.bf16.mxu0 %v417_v29  ;;  %v391_v29 = vld [vmem:[%s1543_s22 + $0x1b8] sm:$0xff]  ;;  %v629_v22 = vld [vmem:[%s1636_s18 + $0x128] sm:$0xff] }
  0x98   : > { %v427_v31 = vpack.c.bf16 %v391_v29, %v387_v28  ;;  %v633_v29 = vld [vmem:[%s1636_s18 + $0x148] sm:$0xff] }
  0x9e   : > { %441 = vmatpush1.bf16.xpose.msra.mxu0 %v416_v34  ;;  %v395_v34 = vld [vmem:[%s1543_s22 + $0x1d8] sm:$0xff] }
  0x9f   : > { %442 = vmatprep.subr.bf16.mxu0 %v421_v35  ;;  %v399_v35 = vld [vmem:[%s1543_s22 + $0x1f8] sm:$0xff] }
  0xa0   : > { %v431_v37 = vpack.c.bf16 %v399_v35, %v395_v34  ;;  %v676_v34 = vpack.c.bf16 %v636_v33, %v632_v32  ;;  %v641_v35 = vld [vmem:[%s1636_s18 + $0x188] sm:$0xff]  ;;  %v647_v32 = vld [vmem:[%s1636_s18 + $0x1b8] sm:$0xff] }
  0xa6   : > { %443 = vmatpush1.bf16.xpose.msra.mxu0 %v420_v40  ;;  %v430_v40 = vpack.c.bf16 %v398_v39, %v394_v38  ;;  %v644_v39 = vld [vmem:[%s1636_s18 + $0x1a0] sm:$0xff] }
  0xa7   : > { %444 = vmatprep.subr.bf16.mxu0 %v425_v41  ;;  %v326_v41 = vld [vmem:[%s1533_s29 + $0x10] sm:$0xff] }
  0xa8   : > { %v334_v43 = vpack.c.bf16 %v330_v42, %v326_v41  ;;  %v649_v41 = vld [vmem:[%s1636_s18 + $0x1c8] sm:$0xff] }
  0xa9   : > { %v653_v42 = vld [vmem:[%s1636_s18 + $0x1e8] sm:$0xff] }
  0xae   : > { %445 = vmatpush1.bf16.xpose.msra.mxu0 %v424_v46  ;;  %v516_v46 = vand.u32 127, %v515_v45  ;;  %v652_v45 = vld [vmem:[%s1636_s18 + $0x1e0] sm:$0xff] }
  0xaf   : > { %446 = vmatprep.subr.bf16.mxu0 %v429_v47 }
  0xb0   : > { %vm519_vm1 = vcmp.lt.s32.totalorder %v516_v46, 10  ;;  %v684_v46 = vpack.c.bf16 %v652_v45, %v648_v44  ;;  %v552_v44 = vld [vmem:[#allocation3] sm:$0xff] }
  0xb6   : > { %447 = vmatpush1.bf16.xpose.msra.mxu0 %v428_v52 }
  0xb7   : > { %473 = vmatprep.subr.bf16.mxu0 %v403_v53  ;;  %v1297_v53 = vmov 0  }
  0xb8   : > { %1099 = vset.pattern.permute.xlu1 %v1297_v53  ;;  %720 = vmatprep.mubr.bf16.mxu1 %v1297_v53 }
  0xb9   : > { %1100 = vset.pattern.permute.xlu0 %v1297_v53 }
  0xbd   : > { %465 = vmatmul.mubr.bf16.vlgmr.msra.gmra.mrb[0].mxu0 %v332_v62  ;;  %v656_v62 = vpack.c.bf16 %v596_v59, %v592_v57 }
  0xbe   : > { %474 = vmatpush1.bf16.xpose.msra.mxu0 %v402_v63  ;;  %505 = vmatprep.mubr.bf16.mxu0 %v335_v0  ;;  %v661_v63 = vpack.c.bf16 %v605_v61, %v601_v60  ;;  %v600_v0 = vld [vmem:[%s1636_s18 + $0x40] sm:$0xff]  ;;  %v594_v60 = vld [vmem:[%s1636_s18 + $0x10] sm:$0xff] }
  0xbf   : > { %475 = vmatprep.subr.bf16.mxu0 %v407_v1  ;;  %v604_v1 = vld [vmem:[%s1636_s18 + $0x60] sm:$0xff]  ;;  %689 = vmatpush1.bf16.msra.mxu1 %v656_v62  ;;  %v598_v61 = vld [vmem:[%s1636_s18 + $0x30] sm:$0xff]  ;;  %v603_v62 = vld [vmem:[%s1636_s18 + $0x58] sm:$0xff] }
  0xc0   : > { %v660_v4 = vpack.c.bf16 %v604_v1, %v600_v0  ;;  %690 = vmatprep.subr.bf16.mxu1 %v661_v63  ;;  %v607_v63 = vld [vmem:[%s1636_s18 + $0x78] sm:$0xff]  ;;  %v658_v1 = vpack.c.bf16 %v598_v61, %v594_v60 }
  0xc1   : > { %v663_v2 = vpack.c.bf16 %v607_v63, %v603_v62 }
  0xc3   : > { %691 = vmatpush1.bf16.msra.mxu1 %v660_v4  ;;  %v611_v4 = vld [vmem:[%s1636_s18 + $0x98] sm:$0xff] }
  0xc4   : > { %692 = vmatprep.subr.bf16.mxu1 %v665_v5  ;;  %v615_v5 = vld [vmem:[%s1636_s18 + $0xb8] sm:$0xff] }
  0xc6   : > { %476 = vmatpush1.bf16.xpose.msra.mxu0 %v406_v6  ;;  %v608_v6 = vld [vmem:[%s1636_s18 + $0x80] sm:$0xff] }
  0xc7   : > { %477 = vmatprep.subr.bf16.mxu0 %v411_v7  ;;  %v612_v7 = vld [vmem:[%s1636_s18 + $0xa0] sm:$0xff] }
  0xc8   : > { %v664_v8 = vpack.c.bf16 %v612_v7, %v608_v6 }
  0xca   : > { %693 = vmatpush1.bf16.msra.mxu1 %v664_v8 }
  0xce   : > { %478 = vmatpush1.bf16.xpose.msra.mxu0 %v410_v12  ;;  %v621_v12 = vld [vmem:[%s1636_s18 + $0xe8] sm:$0xff] }
  0xcf   : > { %479 = vmatprep.subr.bf16.mxu0 %v415_v13  ;;  %v669_v14 = vpack.c.bf16 %v621_v12, %v617_v11  ;;  %v610_v11 = vld [vmem:[%s1636_s18 + $0x90] sm:$0xff] }
  0xd0   : > { %v614_v12 = vld [vmem:[%s1636_s18 + $0xb0] sm:$0xff] }
  0xd1   : > { %694 = vmatprep.subr.bf16.mxu1 %v669_v14  ;;  %v619_v14 = vld [vmem:[%s1636_s18 + $0xd8] sm:$0xff] }
  0xd6   : > { %480 = vmatpush1.bf16.xpose.msra.mxu0 %v414_v18  ;;  %v668_v18 = vpack.c.bf16 %v620_v16, %v616_v15  ;;  %v623_v15 = vld [vmem:[%s1636_s18 + $0xf8] sm:$0xff]  ;;  %v618_v16 = vld [vmem:[%s1636_s18 + $0xd0] sm:$0xff] }
  0xd7   : > { %481 = vmatprep.subr.bf16.mxu0 %v419_v19 }
  0xd8   : > { %695 = vmatpush1.bf16.msra.mxu1 %v668_v18  ;;  %v631_v18 = vld [vmem:[%s1636_s18 + $0x138] sm:$0xff] }
  0xde   : > { %482 = vmatpush1.bf16.xpose.msra.mxu0 %v418_v24  ;;  %v673_v24 = vpack.c.bf16 %v629_v22, %v625_v21  ;;  %v626_v21 = vld [vmem:[%s1636_s18 + $0x110] sm:$0xff] }
  0xdf   : > { %483 = vmatprep.subr.bf16.mxu0 %v423_v25  ;;  %v624_v25 = vld [vmem:[%s1636_s18 + $0x100] sm:$0xff]  ;;  %v630_v22 = vld [vmem:[%s1636_s18 + $0x130] sm:$0xff] }
  0xe0   : > { %v672_v27 = vpack.c.bf16 %v628_v26, %v624_v25  ;;  %696 = vmatprep.subr.bf16.mxu1 %v673_v24  ;;  %v639_v24 = vld [vmem:[%s1636_s18 + $0x178] sm:$0xff]  ;;  %v674_v25 = vpack.c.bf16 %v630_v22, %v626_v21 }
  0xe2   : > { %697 = vmatpush1.bf16.msra.mxu1 %v672_v27 }
  0xe6   : > { %484 = vmatpush1.bf16.xpose.msra.mxu0 %v422_v30  ;;  %v637_v30 = vld [vmem:[%s1636_s18 + $0x168] sm:$0xff] }
  0xe7   : > { %485 = vmatprep.subr.bf16.mxu0 %v427_v31  ;;  %v677_v31 = vpack.c.bf16 %v637_v30, %v633_v29  ;;  %v638_v29 = vld [vmem:[%s1636_s18 + $0x170] sm:$0xff] }
  0xe9   : > { %698 = vmatprep.subr.bf16.mxu1 %v677_v31  ;;  %v643_v31 = vld [vmem:[%s1636_s18 + $0x198] sm:$0xff] }
  0xea   : > { %699 = vmatpush1.bf16.msra.mxu1 %v676_v34  ;;  %v683_v34 = vpack.c.bf16 %v647_v32, %v643_v31 }
  0xee   : > { %486 = vmatpush1.bf16.xpose.msra.mxu0 %v426_v36  ;;  %v645_v36 = vld [vmem:[%s1636_s18 + $0x1a8] sm:$0xff] }
  0xef   : > { %487 = vmatprep.subr.bf16.mxu0 %v431_v37  ;;  %v640_v37 = vld [vmem:[%s1636_s18 + $0x180] sm:$0xff]  ;;  %v681_v38 = vpack.c.bf16 %v645_v36, %v641_v35  ;;  %v642_v35 = vld [vmem:[%s1636_s18 + $0x190] sm:$0xff] }
  0xf0   : > { %v646_v36 = vld [vmem:[%s1636_s18 + $0x1b0] sm:$0xff] }
  0xf1   : > { %700 = vmatprep.subr.bf16.mxu1 %v681_v38  ;;  %v655_v38 = vld [vmem:[%s1636_s18 + $0x1f8] sm:$0xff] }
  0xf6   : > { %488 = vmatpush1.bf16.xpose.msra.mxu0 %v430_v40  ;;  %v680_v40 = vpack.c.bf16 %v644_v39, %v640_v37  ;;  %v651_v37 = vld [vmem:[%s1636_s18 + $0x1d8] sm:$0xff]  ;;  %v682_v39 = vpack.c.bf16 %v646_v36, %v642_v35 }
  0xf8   : > { %701 = vmatpush1.bf16.msra.mxu1 %v680_v40  ;;  %v687_v40 = vpack.c.bf16 %v655_v38, %v651_v37 }
  0xfd   : > { %506 = vmatmul.mubr.bf16.vlgmr.msra.gmra.mrb[0].mxu0 %v334_v43  ;;  %v685_v43 = vpack.c.bf16 %v653_v42, %v649_v41  ;;  %v650_v41 = vld [vmem:[%s1636_s18 + $0x1d0] sm:$0xff] }
  0xfe   : > { %v654_v42 = vld [vmem:[%s1636_s18 + $0x1f0] sm:$0xff] }
  0xff   : > { %702 = vmatprep.subr.bf16.mxu1 %v685_v43  ;;  %v686_v43 = vpack.c.bf16 %v654_v42, %v650_v41 }
 0x100   : > { %703 = vmatpush1.bf16.msra.mxu1 %v684_v46 }
 0x1d0   : > { %v507_v47 = vpop.f32.mrb[0].mxu0 }
 0x1d1   : > { %v509_v48 = vpop.f32.mrb[1].mxu0  ;;  %v1623_v49 = vsel %vm519_vm1, %v507_v47, -1e+30  ;;  %v595_v47 = vld [vmem:[%s1636_s18 + $0x18] sm:$0xff] }
 0x1d2   : > { %524 = vmax.xlane.f32.xlu0 %v1623_v49  ;;  %v510_v50 = vpop.f32.mrb[2].mxu0  ;;  %v599_v48 = vld [vmem:[%s1636_s18 + $0x38] sm:$0xff] }
 0x1d3   : > { %v512_v51 = vpop.f32.mrb[3].mxu0  ;;  %v1626_v52 = vsel %vm519_vm1, %v510_v50, -1e+30  ;;  %v659_v50 = vpack.c.bf16 %v599_v48, %v595_v47  ;;  %v553_v47 = vld [vmem:[#allocation3 + $0x8] sm:$0xff] }
 0x1d5   : > { %731 = vmatprep.subr.bf16.mxu1 %v659_v50 }
 0x1d6   : > { %526 = vmax.xlane.f32.xlu0 %v1626_v52 }
 0x25f   : > { %v525_v10 = vpop.xlane.xlu0 %524 }
 0x260   : > { %v1655_v13 = vmax.f32 %v1650_v9, %v525_v10  ;;  %v667_v10 = vpack.c.bf16 %v615_v5, %v611_v4 }
 0x262   : > { %v530_v19 = vsub.f32 %v1650_v9, %v1655_v13  ;;  %790 = vst.msk [vmem:[#allocation2] sm:$0xff] %vm311_vm0, %v1655_v13  ;;  %538 = vperm.xlu1 %1099, %v1655_v13   ;;  %v666_v9 = vpack.c.bf16 %v614_v12, %v610_v11  ;;  %v671_v13 = vpack.c.bf16 %v623_v15, %v619_v14 }
 0x263   : > { %v527_v20 = vpop.xlane.xlu0 %526 }
 0x264   : > { %v529_v23 = vmax.f32 %v1659_v17, %v527_v20  ;;  %v532_v7 = vmul.f32 1.442695, %v530_v19 }
 0x266   : > { %v531_v28 = vsub.f32 %v1659_v17, %v529_v23  ;;  %791 = vst.msk [vmem:[#allocation2 + $0x8] sm:$0xff] %vm311_vm0, %v529_v23  ;;  %543 = vperm.xlu1 %1099, %v529_v23   ;;  %v622_v17 = vld [vmem:[%s1636_s18 + $0xf0] sm:$0xff]  ;;  %v635_v23 = vld [vmem:[%s1636_s18 + $0x158] sm:$0xff] }
 0x267   : > { %v670_v19 = vpack.c.bf16 %v622_v17, %v618_v16  ;;  %v679_v27 = vpack.c.bf16 %v639_v24, %v635_v23 }
 0x268   : > { %v534_v6 = vmul.f32 1.442695, %v531_v28  ;;  %v634_v28 = vld [vmem:[%s1636_s18 + $0x150] sm:$0xff] }
 0x269   : > { %v678_v33 = vpack.c.bf16 %v638_v29, %v634_v28 }
 0x2e1   : > { %v539_v51 = vpop.permute.xlu1 %538 }
 0x2e2   : > { %v546_v54 = vsub.f32 %v1623_v49, %v539_v51 }
 0x2e4   : > { %v548_v55 = vmul.f32 1.442695, %v546_v54 }
 0x2e5   : > { %v544_v56 = vpop.permute.xlu1 %543 }
 0x2e6   : > { %1101 = vpow2.f32 %v548_v55  ;;  %v547_v57 = vsub.f32 %v1626_v52, %v544_v56  ;;  %v602_v52 = vld [vmem:[%s1636_s18 + $0x50] sm:$0xff] }
 0x2e7   : > { %v662_v8 = vpack.c.bf16 %v606_v3, %v602_v52 }
 0x2e8   : > { %v550_v58 = vmul.f32 1.442695, %v547_v57 }
 0x2ea   : > { %1103 = vpow2.f32 %v550_v58 }
 0x2eb   : > { %1105 = vpow2.f32 %v534_v6 }
 0x2ec   : > { %1107 = vpow2.f32 %v532_v7 }
 0x2f0   : > { %v1102_v59 = vpop.eup %1101 }
 0x2f1   : > { %556 = vadd.xlane.f32.xlu0 %v1102_v59 }
 0x2f4   : > { %v1104_v0 = vpop.eup %1103 }
 0x2f5   : > { %558 = vadd.xlane.f32.xlu1 %v1104_v0  ;;  %v1693_v49 = vpack.c.bf16 %v1104_v0, %v1102_v59  ;;  %v1106_v26 = vpop.eup %1105 }
 0x2f6   : > { %v1108_v30 = vpop.eup %1107  ;;  %v555_v50 = vmul.f32 %v1106_v26, %v553_v47 }
 0x2f7   : > { %721 = vmatmul.mubr.bf16.vlgmr.msra.gmra.mrb[0].mxu1 %v1693_v49  ;;  %v554_v45 = vmul.f32 %v1108_v30, %v552_v44 }
 0x2f8   : > { %732 = vmatpush1.bf16.msra.mxu1 %v658_v1  ;;  %763 = vmatprep.mubr.bf16.mxu1 %v1297_v53  ;;  %v627_v53 = vld [vmem:[%s1636_s18 + $0x118] sm:$0xff] }
 0x2f9   : > { %733 = vmatprep.subr.bf16.mxu1 %v663_v2  ;;  %v675_v20 = vpack.c.bf16 %v631_v18, %v627_v53 }
 0x2fc   : > { %734 = vmatpush1.bf16.msra.mxu1 %v662_v8 }
 0x2fd   : > { %735 = vmatprep.subr.bf16.mxu1 %v667_v10 }
 0x300   : > { %736 = vmatpush1.bf16.msra.mxu1 %v666_v9 }
 0x301   : > { %737 = vmatprep.subr.bf16.mxu1 %v671_v13 }
 0x304   : > { %738 = vmatpush1.bf16.msra.mxu1 %v670_v19 }
 0x305   : > { %739 = vmatprep.subr.bf16.mxu1 %v675_v20 }
 0x306   : > { %580 = vperm.xlu1 %1099, %v1106_v26  }
 0x307   : > { %575 = vperm.xlu0 %1100, %v1108_v30  }
 0x308   : > { %740 = vmatpush1.bf16.msra.mxu1 %v674_v25 }
 0x309   : > { %741 = vmatprep.subr.bf16.mxu1 %v679_v27 }
 0x30c   : > { %742 = vmatpush1.bf16.msra.mxu1 %v678_v33 }
 0x30d   : > { %743 = vmatprep.subr.bf16.mxu1 %v683_v34 }
 0x310   : > { %744 = vmatpush1.bf16.msra.mxu1 %v682_v39 }
 0x311   : > { %745 = vmatprep.subr.bf16.mxu1 %v687_v40 }
 0x314   : > { %746 = vmatpush1.bf16.msra.mxu1 %v686_v43 }
 0x317   : > { %764 = vmatmul.mubr.bf16.vlgmr.msra.gmra.mrb[4].mxu1 %v1693_v49 }
 0x37e   : > { %v557_v46 = vpop.xlane.xlu0 %556 }
 0x37f   : > { %v560_v48 = vadd.f32 %v557_v46, %v554_v45 }
 0x381   : > { %563 = vst.msk [vmem:[#allocation3] sm:$0xff] %vm311_vm0, %v560_v48 }
 0x382   : > { %v559_v51 = vpop.xlane.xlu1 %558 }
 0x383   : > { %v561_v54 = vadd.f32 %v559_v51, %v555_v50 }
 0x385   : > { %564 = vst.msk [vmem:[#allocation3 + $0x8] sm:$0xff] %vm311_vm0, %v561_v54 }
 0x386   : > { %v576_v2 = vpop.permute.xlu0 %575  ;;  %v581_v52 = vpop.permute.xlu1 %580 }
 0x387   : > { %v583_v3 = vmul.f32 0.0, %v576_v2  ;;  %v587_v8 = vmul.f32 0.0, %v581_v52 }
 0x388   : > { %v795_v55 = vld [vmem:[#allocation3] sm:$0xff] }
 0x389   : > { %1109 = vrcp.f32 %v795_v55 }
 0x38c   : > { %v796_v56 = vld [vmem:[#allocation3 + $0x8] sm:$0xff] }
 0x38d   : > { %1111 = vrcp.f32 %v796_v56 }
 0x393   : > { %v1110_v57 = vpop.eup %1109 }
 0x394   : > { %809 = vperm.xlu0 %1100, %v1110_v57  }
 0x397   : > { %v1112_v58 = vpop.eup %1111 }
 0x398   : > { %814 = vperm.xlu0 %1100, %v1112_v58  }
 0x3ca   : > { %v722_v59 = vpop.f32.mrb[0].mxu1 }
 0x3cb   : > { %v724_v60 = vpop.f32.mrb[1].mxu1  ;;  %v774_v4 = vadd.f32 %v722_v59, %v583_v3 }
 0x3cc   : > { %v726_v61 = vpop.f32.mrb[2].mxu1  ;;  %v775_v5 = vadd.f32 %v724_v60, %v583_v3 }
 0x3cd   : > { %v728_v62 = vpop.f32.mrb[3].mxu1  ;;  %v778_v9 = vadd.f32 %v726_v61, %v587_v8 }
 0x3ce   : > { %v779_v13 = vadd.f32 %v728_v62, %v587_v8 }
 0x3ea   : > { %v765_v63 = vpop.f32.mrb[4].mxu1 }
 0x3eb   : > { %v767_v0 = vpop.f32.mrb[5].mxu1  ;;  %v776_v6 = vadd.f32 %v765_v63, %v583_v3 }
 0x3ec   : > { %v769_v1 = vpop.f32.mrb[6].mxu1  ;;  %v777_v7 = vadd.f32 %v767_v0, %v583_v3 }
 0x3ed   : > { %v771_v49 = vpop.f32.mrb[7].mxu1  ;;  %v780_v16 = vadd.f32 %v769_v1, %v587_v8 }
 0x3ee   : > { %v781_v17 = vadd.f32 %v771_v49, %v587_v8 }
 0x413   : > { %v810_v10 = vpop.permute.xlu0 %809 }
 0x414   : > { %v817_v11 = vmul.f32 %v810_v10, %v774_v4  ;;  %v818_v12 = vmul.f32 %v810_v10, %v775_v5  ;;  %v819_v14 = vmul.f32 %v810_v10, %v776_v6  ;;  %v820_v15 = vmul.f32 %v810_v10, %v777_v7 }
 0x416   : > { %825 = vst [vmem:[%s301_s8] sm:$0xff] %v817_v11  ;;  %826 = vst [vmem:[%s301_s8 + $0x8] sm:$0xff] %v818_v12 }
 0x417   : > { %827 = vst [vmem:[%s301_s8 + $0x10] sm:$0xff] %v819_v14  ;;  %828 = vst [vmem:[%s301_s8 + $0x18] sm:$0xff] %v820_v15  ;;  %v815_v53 = vpop.permute.xlu0 %814 }
 0x418   : > { %v821_v18 = vmul.f32 %v815_v53, %v778_v9  ;;  %v822_v19 = vmul.f32 %v815_v53, %v779_v13  ;;  %v823_v20 = vmul.f32 %v815_v53, %v780_v16  ;;  %v824_v21 = vmul.f32 %v815_v53, %v781_v17 }
 0x41a   : > { %829 = vst [vmem:[%s301_s8 + $0x20] sm:$0xff] %v821_v18  ;;  %830 = vst [vmem:[%s301_s8 + $0x28] sm:$0xff] %v822_v19 }
 0x41b   : > { %831 = vst [vmem:[%s301_s8 + $0x30] sm:$0xff] %v823_v20  ;;  %832 = vst [vmem:[%s301_s8 + $0x38] sm:$0xff] %v824_v21 }
 0x41c   : > { %1216 = shalt.err (!%p1213_p13)
}
 0x41d   : > { %s1217_s5 = scalar_lea.hbm %s1735_s20, 1024  ;;  %s1221_s14 = scalar_lea.hbm %s1789_s3, 2048 }
 0x41e   : > { %p1218_p7 = scmp.ne.s32.totalorder %s1735_s20, %s1217_s5  ;;  %p1222_p5 = scmp.lt.u32.totalorder %s1735_s20, %s1789_s3 }
 0x41f   : > { %p1223_p2 = scmp.lt.u32.totalorder %s1221_s14, %s1217_s5  ;;  %p1225_p0 = scmp.lt.u32.totalorder %s1217_s5, %s1735_s20 }
 0x420   : > { %p1219_p11 = pnand %p1218_p7, %p1811_p6 }
 0x421   : > { %p1224_p1 = por %p1223_p2, %p1222_p5 }
 0x422   : > { %p1220_p3 = pneg %p1219_p11 }
 0x423   : > { %p1226_p8 = por %p1225_p0, %p1224_p1 }
 0x425   : > { %p1227_p9 = pnand %p1226_p8, %p1220_p3 }
 0x427   : > { %1230 = shalt.err (!%p1227_p9)
}
 0x428   : > { %s1300_s11 = smov 512   ;;  %s1301_s6 = smov 32  }
 0x429   : > { %1026 = dma.vmem_to_hbm [thread:$0]  (%p1811_p6), %s1737_s30, 1024, %s1735_s20, %s834_s15, %s1300_s11, %s1300_s11, %s1301_s6  }
 0x42a PF: > { %s865_s22 = sand.u32 1, %s1269_s12   ;;  %p1812_p12 = scmp.ne.s32.totalorder %s1803_s27, 0 }
 0x42b   : > { %p1813_p4 = scmp.ge.s32.totalorder %s1289_s17, 2  ;;  %s866_s18 = scalar_lea.sflag [#allocation7], %s865_s22 }
 0x42d   : > { %p1039_p10 = pnand %p1813_p4, %p1812_p12 }
 0x42f   : > { %1264 = dma.done.wait (!%p1039_p10), %s866_s18, 1024  }
 0x430   : > { %1266 = vsyncadd (!%p1039_p10), %s866_s18, 4294966272  ;;  %s22_s17 = sadd.s32 1, %s1289_s17   ;;  %s1814_s24 = sld [smem:[#allocation15_spill]] }
 0x431   : > { %p19_p13 = scmp.ge.s32.totalorder %s22_s17, 4   ;;  %s1815_s14 = sld [smem:[#allocation17_spill]] }
 0x432   : > { %s1816_s25 = sld [smem:[#allocation16_spill]]  ;;  %s1817_s12 = smov %s1273_s13 }
 0x433   : > { %s1819_s15 = smov %s1285_s16  ;;  %21 = sbr.rel (!%p19_p13) target bundleno = 10 (0xa), region = 109 }
 0x436   : > { %s1818_s13 = smov %s1814_s24 }
 0x438   : > { %s1820_s16 = smov %s1816_s25 }
 0x43a   :  { %871 = vsyncpa [#allocation6], 1 }
 0x43b   :  { %873 = vsyncpa [#allocation6 + $0x1], 1 }
 0x43c   :  { %874 = vsyncpa [#allocation9], 1 }
 0x43d   :  { %876 = vsyncpa [#allocation9 + $0x1], 1 }
 0x43e   :  { %877 = vsyncpa [#allocation7], 1 }
 0x43f   :  { %879 = vsyncpa [#allocation7 + $0x1], 1 }

</bundles_post_ra>
